<compile_context>
chip_gen: v6e
topology: v6e:2x2x1
jax: 0.10.0
libtpu: 0.0.40
codegen_flags: <defaults>
</compile_context>

<pallas_src>
import jax
import jax.numpy as jnp
from jax import lax
from jax.experimental import pallas as pl
from jax.experimental.pallas import tpu as pltpu

_LANE = 128


def _round_up(n, m):
    return ((n + m - 1) // m) * m


def _cdiv(a, b):
    return -(-a // b)


def _make_kernel(n_chunks, n_safe, d_tile, d_true):
    """Kernel for one (r_tile, d_tile) tile; d_tile == n_chunks * 128.

    Chunks [0, n_safe) are fully in-bounds for every D-tile index (no mask).
    Chunks [n_safe, n_chunks) may overhang the true D on the last D tile and
    are masked against the global column index.
    """
    n_tail = n_chunks - n_safe

    def kernel(x_ref, xh_ref, cos_ref, dot_acc, na_acc, nb_acc):
        k = pl.program_id(1)

        @pl.when(k == 0)
        def _init():
            dot_acc[...] = jnp.zeros_like(dot_acc)
            na_acc[...] = jnp.zeros_like(na_acc)
            nb_acc[...] = jnp.zeros_like(nb_acc)

        def load_chunk(c):
            start = pl.multiple_of(c * _LANE, _LANE)
            a = x_ref[:, pl.ds(start, _LANE)].astype(jnp.float32) - 0.5
            b = xh_ref[:, pl.ds(start, _LANE)].astype(jnp.float32) - 0.5
            return a, b

        def accum(carry, a, b):
            dsum, asum, bsum = carry
            return (dsum + a * b, asum + a * a, bsum + b * b)

        # Lane-shaped partial sums carried in registers across the chunk
        # loops; exactly one VMEM scratch read + write per grid step.
        carry = (dot_acc[...], na_acc[...], nb_acc[...])

        if n_safe > 0:
            def safe_body(c, cr):
                a, b = load_chunk(c)
                return accum(cr, a, b)

            carry = lax.fori_loop(0, n_safe, safe_body, carry,
                                  unroll=min(8, n_safe))

        if n_tail > 0:
            lane = lax.broadcasted_iota(jnp.int32, (1, _LANE), 1)
            col0 = k * d_tile + lane        # global column of chunk 0, lane i

            def tail_body(c, cr):
                a, b = load_chunk(c)
                valid = (col0 + c * _LANE) < d_true
                a = jnp.where(valid, a, 0.0)
                b = jnp.where(valid, b, 0.0)
                return accum(cr, a, b)

            carry = lax.fori_loop(n_safe, n_chunks, tail_body, carry,
                                  unroll=min(8, n_tail))

        dot_acc[...], na_acc[...], nb_acc[...] = carry

        @pl.when(k == pl.num_programs(1) - 1)
        def _finalize():
            dot = jnp.sum(dot_acc[...], axis=1, keepdims=True)
            na2 = jnp.sum(na_acc[...], axis=1, keepdims=True)
            nb2 = jnp.sum(nb_acc[...], axis=1, keepdims=True)
            # dot / (||a|| * ||b||) with eps=0, via rsqrt (EUP slot).
            cos_ref[...] = (dot * lax.rsqrt(na2 * nb2)).astype(cos_ref.dtype)

    return kernel


def cos_similarity(x_hat, x, *, max_row_tile=64, max_d_tile=32768,
                   target_step_bytes=12 << 20):
    """Mirrors CosSimilarity().forward(x_hat, x). Inputs: (B, 2, H, W)."""
    assert x.shape == x_hat.shape and x.ndim == 4 and x.shape[1] == 2
    B, C, H, W = x.shape
    R = B * C
    D = H * W

    # Keep bf16 inputs as bf16 (halves HBM traffic); anything else -> f32.
    in_dtype = x.dtype if x.dtype in (jnp.float32, jnp.bfloat16) else jnp.float32
    x_flat = x.reshape(R, D)
    xh_flat = x_hat.reshape(R, D)
    if x_flat.dtype != in_dtype:
        x_flat = x_flat.astype(in_dtype)
        xh_flat = xh_flat.astype(in_dtype)
    itemsize = jnp.dtype(in_dtype).itemsize
    sub = 8 if itemsize == 4 else 16          # sublane packing unit

    # ---- row tiling (parallel axis). r_tile <= 64 keeps the 3 lane-shaped
    # f32 accumulators (3 * r_tile/8 vregs) + per-chunk temporaries inside the
    # 64-vreg file, so nothing spills per chunk. ----
    max_rt = max(sub, (max_row_tile // sub) * sub)
    r_ceil = _round_up(R, sub)
    r_tile = min(max_rt, r_ceil)
    num_r_tiles = _cdiv(r_ceil, r_tile)
    if num_r_tiles < 2 and r_ceil >= 2 * sub:
        # Give the "parallel" row axis >= 2 tiles so v7x's second TensorCore
        # gets work (moot on 1-TC v5e/v6e).
        r_tile = _round_up(_cdiv(r_ceil, 2), sub)
        num_r_tiles = _cdiv(r_ceil, r_tile)
    r_out = num_r_tiles * r_tile
    # TODO(synk): for tiny batches (R < 2*sub) only one row tile exists; a
    # D-split "parallel" axis with per-core partial sums would be needed to
    # occupy both v7x TensorCores in that regime.

    # ---- D tiling (reduction axis, last in grid). Size the tile so each grid
    # step moves ~target_step_bytes of input, keeping the double-buffered
    # footprint ~2x that (fits v7x's 64 MiB VMEM; explicit vmem_limit below
    # covers v5e's 16 MiB scoped default). ----
    d_chunks = _cdiv(D, _LANE)
    budget_chunks = max(1, target_step_bytes // (2 * r_tile * itemsize * _LANE))
    budget_chunks = max(1, min(budget_chunks, max_d_tile // _LANE))
    chunks_per_tile = min(d_chunks, budget_chunks)
    num_d_tiles = _cdiv(d_chunks, chunks_per_tile)
    chunks_per_tile = _cdiv(d_chunks, num_d_tiles)    # rebalance tiles
    num_d_tiles = _cdiv(d_chunks, chunks_per_tile)    # last tile never empty
    d_tile = chunks_per_tile * _LANE

    # Chunks fully in-bounds even on the last D tile need no masking; only the
    # (few) remaining chunks get the lane mask. No host-side padding copies.
    n_safe = min(chunks_per_tile,
                 max(0, (D - (num_d_tiles - 1) * d_tile) // _LANE))

    # Double-buffered inputs + accumulators + output + headroom.
    vmem_limit = (2 * 2 * r_tile * d_tile * itemsize
                  + 3 * r_tile * _LANE * 4
                  + 2 * r_tile * 4
                  + (4 << 20))
    vmem_limit = int(max(vmem_limit, 32 << 20))

    cost = pl.CostEstimate(
        flops=8 * r_out * num_d_tiles * d_tile,
        transcendentals=r_out,
        bytes_accessed=2 * R * D * itemsize + r_out * 4,
    )

    cos_rows = pl.pallas_call(
        _make_kernel(chunks_per_tile, n_safe, d_tile, D),
        out_shape=jax.ShapeDtypeStruct((r_out, 1), jnp.float32),
        grid_spec=pltpu.PrefetchScalarGridSpec(
            num_scalar_prefetch=0,
            grid=(num_r_tiles, num_d_tiles),
            in_specs=[
                pl.BlockSpec((r_tile, d_tile), lambda i, k: (i, k)),
                pl.BlockSpec((r_tile, d_tile), lambda i, k: (i, k)),
            ],
            out_specs=pl.BlockSpec((r_tile, 1), lambda i, k: (i, 0)),
            scratch_shapes=[pltpu.VMEM((r_tile, _LANE), jnp.float32)] * 3,
        ),
        compiler_params=pltpu.CompilerParams(
            dimension_semantics=("parallel", "arbitrary"),
            vmem_limit_bytes=vmem_limit),
        cost_estimate=cost,
    )(x_flat, xh_flat)

    # Mean over the true 2*B rows == 0.5 * (mean_real + mean_imag).
    # Overhanging (garbage / NaN) rows are dropped by the [:R] slice.
    return jnp.mean(cos_rows[:R, 0])


def _reference(x_hat, x):
    # Pure-JAX reference of rho() for sanity checking.
    B = x.shape[0]
    xr = x[:, 0].reshape(B, -1).astype(jnp.float32) - 0.5
    xi = x[:, 1].reshape(B, -1).astype(jnp.float32) - 0.5
    hr = x_hat[:, 0].reshape(B, -1).astype(jnp.float32) - 0.5
    hi = x_hat[:, 1].reshape(B, -1).astype(jnp.float32) - 0.5

    def cos(a, b):
        return jnp.sum(a * b, axis=1) / (
            jnp.linalg.norm(a, axis=1) * jnp.linalg.norm(b, axis=1))

    return 0.5 * (jnp.mean(cos(xr, hr)) + jnp.mean(cos(xi, hi)))


if __name__ == "__main__":
    key = jax.random.PRNGKey(0)
    k1, k2, k3, k4, k5, k6 = jax.random.split(key, 6)

    # 1) Lane-aligned (B, 2, H, W) f32; exercises row-overhang path (R=4 -> 8).
    B, C, H, W = 2, 2, 16, 16  # channel dim must be 2 (real / imag)
    x = jax.random.uniform(k1, (B, C, H, W), dtype=jnp.float32)
    x_hat = jax.random.uniform(k2, (B, C, H, W), dtype=jnp.float32)
    out = cos_similarity(x_hat, x)
    jax.block_until_ready(out)
    ref = _reference(x_hat, x)
    assert jnp.allclose(out, ref, atol=1e-5, rtol=1e-4), (out, ref)

    # 2) Non-128-multiple spatial size: in-kernel ragged-chunk masking, no pad.
    x2 = jax.random.uniform(k3, (3, 2, 10, 10), dtype=jnp.float32)
    x2_hat = jax.random.uniform(k4, (3, 2, 10, 10), dtype=jnp.float32)
    out2 = cos_similarity(x2_hat, x2)
    jax.block_until_ready(out2)
    ref2 = _reference(x2_hat, x2)
    assert jnp.allclose(out2, ref2, atol=1e-5, rtol=1e-4), (out2, ref2)

    # 3) Force multiple D tiles (accumulation across the grid's reduction
    #    axis) plus a 2-way row split, via a tiny max_d_tile override.
    x3 = jax.random.uniform(k5, (8, 2, 24, 24), dtype=jnp.float32)
    x3_hat = jax.random.uniform(k6, (8, 2, 24, 24), dtype=jnp.float32)
    out3 = cos_similarity(x3_hat, x3, max_d_tile=256)
    jax.block_until_ready(out3)
    ref3 = _reference(x3_hat, x3)
    assert jnp.allclose(out3, ref3, atol=1e-5, rtol=1e-4), (out3, ref3)

    # 4) bf16 passthrough (tolerance reflects bf16 input precision).
    x4 = x3.astype(jnp.bfloat16)
    x4_hat = x3_hat.astype(jnp.bfloat16)
    out4 = cos_similarity(x4_hat, x4)
    jax.block_until_ready(out4)
    ref4 = _reference(x4_hat, x4)
    assert jnp.allclose(out4, ref4, atol=5e-3, rtol=5e-3), (out4, ref4)

    print("KERNEL_OK")
</pallas_src>

<mosaic_0001>
module attributes {stable_mosaic.version = 11 : i64} {
  func.func @kernel(%arg0: i32, %arg1: i32, %arg2: memref<8x256xf32, #tpu.memory_space<vmem>>, %arg3: memref<8x256xf32, #tpu.memory_space<vmem>>, %arg4: memref<8x1xf32, #tpu.memory_space<vmem>>, %arg5: memref<8x128xf32, #tpu.memory_space<vmem>>, %arg6: memref<8x128xf32, #tpu.memory_space<vmem>>, %arg7: memref<8x128xf32, #tpu.memory_space<vmem>>) attributes {dimension_semantics = [#tpu.dimension_semantics<parallel>, #tpu.dimension_semantics<arbitrary>], iteration_bounds = array<i64: 1, 1>, scalar_prefetch = 0 : i64, scratch_operands = 3 : i64, tpu.core_type = #tpu.core_type<tc>, window_params = [{transform_indices = @transform_0, window_bounds = array<i64: 8, 256>}, {transform_indices = @transform_1, window_bounds = array<i64: 8, 256>}, {transform_indices = @transform_2, window_bounds = array<i64: 8, 1>}]} {
    %c0_i32 = arith.constant 0 : i32
    %0 = arith.cmpi eq, %arg1, %c0_i32 : i32
    %1 = arith.extui %0 : i1 to i32
    %c0_i32_0 = arith.constant 0 : i32
    %2 = arith.cmpi ne, %1, %c0_i32_0 : i32
    scf.if %2 {
      %cst_23 = arith.constant 0.000000e+00 : f32
      %44 = vector.broadcast %cst_23 : f32 to vector<8x128xf32>
      %c0_24 = arith.constant 0 : index
      %c0_25 = arith.constant 0 : index
      %45 = vector.load %arg5[%c0_24, %c0_25] : memref<8x128xf32, #tpu.memory_space<vmem>>, vector<8x128xf32>
      tpu.vector_store %arg5[%c0_24, %c0_25], %44 {strides = array<i32>} : memref<8x128xf32, #tpu.memory_space<vmem>>, vector<8x128xf32>,
      %cst_26 = arith.constant 0.000000e+00 : f32
      %46 = vector.broadcast %cst_26 : f32 to vector<8x128xf32>
      %c0_27 = arith.constant 0 : index
      %c0_28 = arith.constant 0 : index
      %47 = vector.load %arg6[%c0_27, %c0_28] : memref<8x128xf32, #tpu.memory_space<vmem>>, vector<8x128xf32>
      tpu.vector_store %arg6[%c0_27, %c0_28], %46 {strides = array<i32>} : memref<8x128xf32, #tpu.memory_space<vmem>>, vector<8x128xf32>,
      %cst_29 = arith.constant 0.000000e+00 : f32
      %48 = vector.broadcast %cst_29 : f32 to vector<8x128xf32>
      %c0_30 = arith.constant 0 : index
      %c0_31 = arith.constant 0 : index
      %49 = vector.load %arg7[%c0_30, %c0_31] : memref<8x128xf32, #tpu.memory_space<vmem>>, vector<8x128xf32>
      tpu.vector_store %arg7[%c0_30, %c0_31], %48 {strides = array<i32>} : memref<8x128xf32, #tpu.memory_space<vmem>>, vector<8x128xf32>,
    } else {
    }
    %c0 = arith.constant 0 : index
    %c0_1 = arith.constant 0 : index
    %3 = vector.load %arg5[%c0, %c0_1] : memref<8x128xf32, #tpu.memory_space<vmem>>, vector<8x128xf32>
    %c0_2 = arith.constant 0 : index
    %c0_3 = arith.constant 0 : index
    %4 = vector.load %arg6[%c0_2, %c0_3] : memref<8x128xf32, #tpu.memory_space<vmem>>, vector<8x128xf32>
    %c0_4 = arith.constant 0 : index
    %c0_5 = arith.constant 0 : index
    %5 = vector.load %arg7[%c0_4, %c0_5] : memref<8x128xf32, #tpu.memory_space<vmem>>, vector<8x128xf32>
    %c0_i32_6 = arith.constant 0 : i32
    %c128_i32 = arith.constant 128 : i32
    %6 = arith.muli %c0_i32_6, %c128_i32 : i32
    %7 = tpu.assume_multiple %6, 128 : i32
    %c0_7 = arith.constant 0 : index
    %8 = arith.index_cast %7 : i32 to index
    %9 = vector.load %arg2[%c0_7, %8] : memref<8x256xf32, #tpu.memory_space<vmem>>, vector<8x128xf32>
    %cst = arith.constant 5.000000e-01 : f32
    %10 = vector.broadcast %cst : f32 to vector<8x128xf32>
    %11 = arith.subf %9, %10 : vector<8x128xf32>
    %c0_8 = arith.constant 0 : index
    %12 = arith.index_cast %7 : i32 to index
    %13 = vector.load %arg3[%c0_8, %12] : memref<8x256xf32, #tpu.memory_space<vmem>>, vector<8x128xf32>
    %cst_9 = arith.constant 5.000000e-01 : f32
    %14 = vector.broadcast %cst_9 : f32 to vector<8x128xf32>
    %15 = arith.subf %13, %14 : vector<8x128xf32>
    %16 = arith.mulf %11, %15 : vector<8x128xf32>
    %17 = arith.addf %3, %16 : vector<8x128xf32>
    %18 = arith.mulf %11, %11 : vector<8x128xf32>
    %19 = arith.addf %4, %18 : vector<8x128xf32>
    %20 = arith.mulf %15, %15 : vector<8x128xf32>
    %21 = arith.addf %5, %20 : vector<8x128xf32>
    %c1_i32 = arith.constant 1 : i32
    %c128_i32_10 = arith.constant 128 : i32
    %22 = arith.muli %c1_i32, %c128_i32_10 : i32
    %23 = tpu.assume_multiple %22, 128 : i32
    %c0_11 = arith.constant 0 : index
    %24 = arith.index_cast %23 : i32 to index
    %25 = vector.load %arg2[%c0_11, %24] : memref<8x256xf32, #tpu.memory_space<vmem>>, vector<8x128xf32>
    %cst_12 = arith.constant 5.000000e-01 : f32
    %26 = vector.broadcast %cst_12 : f32 to vector<8x128xf32>
    %27 = arith.subf %25, %26 : vector<8x128xf32>
    %c0_13 = arith.constant 0 : index
    %28 = arith.index_cast %23 : i32 to index
    %29 = vector.load %arg3[%c0_13, %28] : memref<8x256xf32, #tpu.memory_space<vmem>>, vector<8x128xf32>
    %cst_14 = arith.constant 5.000000e-01 : f32
    %30 = vector.broadcast %cst_14 : f32 to vector<8x128xf32>
    %31 = arith.subf %29, %30 : vector<8x128xf32>
    %32 = arith.mulf %27, %31 : vector<8x128xf32>
    %33 = arith.addf %17, %32 : vector<8x128xf32>
    %34 = arith.mulf %27, %27 : vector<8x128xf32>
    %35 = arith.addf %19, %34 : vector<8x128xf32>
    %36 = arith.mulf %31, %31 : vector<8x128xf32>
    %37 = arith.addf %21, %36 : vector<8x128xf32>
    %c2_i32 = arith.constant 2 : i32
    %c0_15 = arith.constant 0 : index
    %c0_16 = arith.constant 0 : index
    %38 = vector.load %arg5[%c0_15, %c0_16] : memref<8x128xf32, #tpu.memory_space<vmem>>, vector<8x128xf32>
    tpu.vector_store %arg5[%c0_15, %c0_16], %33 {strides = array<i32>} : memref<8x128xf32, #tpu.memory_space<vmem>>, vector<8x128xf32>,
    %c0_17 = arith.constant 0 : index
    %c0_18 = arith.constant 0 : index
    %39 = vector.load %arg6[%c0_17, %c0_18] : memref<8x128xf32, #tpu.memory_space<vmem>>, vector<8x128xf32>
    tpu.vector_store %arg6[%c0_17, %c0_18], %35 {strides = array<i32>} : memref<8x128xf32, #tpu.memory_space<vmem>>, vector<8x128xf32>,
    %c0_19 = arith.constant 0 : index
    %c0_20 = arith.constant 0 : index
    %40 = vector.load %arg7[%c0_19, %c0_20] : memref<8x128xf32, #tpu.memory_space<vmem>>, vector<8x128xf32>
    tpu.vector_store %arg7[%c0_19, %c0_20], %37 {strides = array<i32>} : memref<8x128xf32, #tpu.memory_space<vmem>>, vector<8x128xf32>,
    %c0_i32_21 = arith.constant 0 : i32
    %41 = arith.cmpi eq, %arg1, %c0_i32_21 : i32
    %42 = arith.extui %41 : i1 to i32
    %c0_i32_22 = arith.constant 0 : i32
    %43 = arith.cmpi ne, %42, %c0_i32_22 : i32
    scf.if %43 {
      %c0_23 = arith.constant 0 : index
      %c0_24 = arith.constant 0 : index
      %44 = vector.load %arg5[%c0_23, %c0_24] : memref<8x128xf32, #tpu.memory_space<vmem>>, vector<8x128xf32>
      %cst_25 = arith.constant dense<0.000000e+00> : vector<8xf32>
      %45 = vector.multi_reduction <add>, %44, %cst_25 [1] : vector<8x128xf32> to vector<8xf32>
      %46 = vector.shape_cast %45 : vector<8xf32> to vector<8x1xf32>
      %c0_26 = arith.constant 0 : index
      %c0_27 = arith.constant 0 : index
      %47 = vector.load %arg6[%c0_26, %c0_27] : memref<8x128xf32, #tpu.memory_space<vmem>>, vector<8x128xf32>
      %cst_28 = arith.constant dense<0.000000e+00> : vector<8xf32>
      %48 = vector.multi_reduction <add>, %47, %cst_28 [1] : vector<8x128xf32> to vector<8xf32>
      %49 = vector.shape_cast %48 : vector<8xf32> to vector<8x1xf32>
      %c0_29 = arith.constant 0 : index
      %c0_30 = arith.constant 0 : index
      %50 = vector.load %arg7[%c0_29, %c0_30] : memref<8x128xf32, #tpu.memory_space<vmem>>, vector<8x128xf32>
      %cst_31 = arith.constant dense<0.000000e+00> : vector<8xf32>
      %51 = vector.multi_reduction <add>, %50, %cst_31 [1] : vector<8x128xf32> to vector<8xf32>
      %52 = vector.shape_cast %51 : vector<8xf32> to vector<8x1xf32>
      %53 = arith.mulf %49, %52 : vector<8x1xf32>
      %54 = math.rsqrt %53 : vector<8x1xf32>
      %55 = arith.mulf %46, %54 : vector<8x1xf32>
      %c0_32 = arith.constant 0 : index
      %c0_33 = arith.constant 0 : index
      %56 = vector.load %arg4[%c0_32, %c0_33] : memref<8x1xf32, #tpu.memory_space<vmem>>, vector<8x1xf32>
      tpu.vector_store %arg4[%c0_32, %c0_33], %55 {strides = array<i32>} : memref<8x1xf32, #tpu.memory_space<vmem>>, vector<8x1xf32>,
    } else {
    }
    return
  }
  func.func @transform_0(%arg0: i32, %arg1: i32) -> (i32, i32) {
    %c0_i32 = arith.constant 0 : i32
    return %arg0, %arg1 : i32, i32
  }
  func.func @transform_1(%arg0: i32, %arg1: i32) -> (i32, i32) {
    %c0_i32 = arith.constant 0 : i32
    return %arg0, %arg1 : i32, i32
  }
  func.func @transform_2(%arg0: i32, %arg1: i32) -> (i32, i32) {
    %c0_i32 = arith.constant 0 : i32
    %c0_i32_0 = arith.constant 0 : i32
    return %arg0, %c0_i32 : i32, i32
  }
}

</mosaic_0001>

<bundles_post_ra>
// kernel: tpu_custom_call.1
= control target key start
LH: loop header
LB: loop body
LE: loop exit
PB: predicated region body
PF: predicated region fallthrough
CT: control target
= control target key end

     0   :  { %7 = vsyncpa [#allocation6], 0  ;;  %s221_s0 = inlined_call_operand.hbm [shape: f32[4,256], index: 0, kind: input, shape index: {}]   ;;  %s222_s1 = inlined_call_operand.hbm [shape: f32[4,256], index: 1, kind: input, shape index: {}]   ;;  %s223_s2 = inlined_call_operand.vmem [shape: f32[8,1], index: 2, kind: output, shape index: {}]  }
   0x1   :  { %8 = vsyncpa [#allocation8], 0 }
   0x2   :  { %13 = vsyncadd [#allocation6], 128  ;;  %s193_s9 = smov [#allocation5]  }
   0x3   :  { %s14_s10 = sshll.u32 %s193_s9, 4  ;;  %s15_s10 = int_to_ptr.vmem [resolvable:$true] %s14_s10 }
   0x4   :  { %s157_s11 = scalar_lea.vmem %s15_s10, 128  ;;  %s161_s12 = scalar_lea.vmem %s15_s10, 256 }
   0x5   :  { %p158_p0 = scmp.ne.s32.totalorder %s15_s10, %s157_s11  ;;  %p162_p1 = scmp.lt.s32.totalorder %s15_s10, %s15_s10 }
   0x6   :  { %p163_p2 = scmp.lt.s32.totalorder %s161_s12, %s157_s11 }
   0x8   :  { %p164_p3 = por %p163_p2, %p162_p1 }
   0xa   :  { %p165_p4 = pnand %p164_p3, %p158_p0 }
   0xc   :  { %168 = shalt.err (!%p165_p4)
}
   0xd   :  { %s194_s13 = smov 128   ;;  %s195_s14 = smov 8  }
   0xe   :  { %20 = dma.hbm_to_vmem [thread:$0]  %s221_s0, 128, %s15_s10, [#allocation6], %s194_s13, %s194_s13, %s195_s14  }
   0xf   :  { %25 = vsyncadd [#allocation8], 128  ;;  %s196_s17 = smov [#allocation7]  }
  0x10   :  { %s26_s18 = sshll.u32 %s196_s17, 4  ;;  %s27_s18 = int_to_ptr.vmem [resolvable:$true] %s26_s18 }
  0x11   :  { %s177_s19 = scalar_lea.vmem %s27_s18, 128  ;;  %s181_s20 = scalar_lea.vmem %s27_s18, 256 }
  0x12   :  { %p178_p5 = scmp.ne.s32.totalorder %s27_s18, %s177_s19  ;;  %p182_p6 = scmp.lt.s32.totalorder %s27_s18, %s27_s18 }
  0x13   :  { %p183_p7 = scmp.lt.s32.totalorder %s181_s20, %s177_s19 }
  0x15   :  { %p184_p8 = por %p183_p7, %p182_p6 }
  0x17   :  { %p185_p9 = pnand %p184_p8, %p178_p5 }
  0x19   :  { %188 = shalt.err (!%p185_p9)
}
  0x1a   :  { %32 = dma.hbm_to_vmem [thread:$0]  %s222_s1, 128, %s27_s18, [#allocation8], %s194_s13, %s194_s13, %s195_s14  }
  0x1b   :  { %189 = dma.done.wait [#allocation6], 256  }
  0x1c   :  { %190 = vsyncadd [#allocation6], 4294967040 }
  0x1d   :  { %191 = dma.done.wait [#allocation8], 256  }
  0x1e   :  { %192 = vsyncadd [#allocation8], 4294967040  ;;  %v49_v0 = vld [vmem:[#allocation5] sm:$0xf]  ;;  %v50_v1 = vld [vmem:[#allocation5 + $0x8] sm:$0xf] }
  0x1f   :  { %v79_v2 = vld [vmem:[#allocation5 + $0x4] sm:$0xf]  ;;  %v135_v3 = vadd.f32 -0.5, %v49_v0  ;;  %v136_v4 = vadd.f32 -0.5, %v50_v1  ;;  %v80_v5 = vld [vmem:[#allocation5 + $0xc] sm:$0xf] }
  0x20   :  { %v139_v6 = vadd.f32 -0.5, %v79_v2  ;;  %v140_v7 = vadd.f32 -0.5, %v80_v5  ;;  %v53_v8 = vld [vmem:[#allocation7] sm:$0xf]  ;;  %v54_v9 = vld [vmem:[#allocation7 + $0x8] sm:$0xf] }
  0x21   :  { %v64_v10 = vmul.f32 %v135_v3, %v135_v3  ;;  %v65_v11 = vmul.f32 %v136_v4, %v136_v4  ;;  %v137_v13 = vadd.f32 -0.5, %v53_v8  ;;  %v84_v14 = vld [vmem:[#allocation7 + $0x4] sm:$0xf]  ;;  %v85_v15 = vld [vmem:[#allocation7 + $0xc] sm:$0xf]  ;;  %v138_v17 = vadd.f32 -0.5, %v54_v9 }
  0x22   :  { %v95_v12 = vmul.f32 %v139_v6, %v139_v6  ;;  %v96_v16 = vmul.f32 %v140_v7, %v140_v7  ;;  %v141_v18 = vadd.f32 -0.5, %v84_v14  ;;  %v142_v19 = vadd.f32 -0.5, %v85_v15 }
  0x23   :  { %v68_v20 = vcombine.low %v64_v10, %v65_v11  ;;  %v71_v21 = vmul.f32 %v137_v13, %v137_v13  ;;  %v57_v22 = vmul.f32 %v137_v13, %v135_v3  ;;  %v72_v24 = vmul.f32 %v138_v17, %v138_v17 }
  0x24   :  { %v99_v23 = vcombine.low %v95_v12, %v96_v16  ;;  %v102_v25 = vmul.f32 %v141_v18, %v141_v18  ;;  %v103_v26 = vmul.f32 %v142_v19, %v142_v19  ;;  %v58_v27 = vmul.f32 %v138_v17, %v136_v4 }
  0x25   :  { %v88_v28 = vmul.f32 %v141_v18, %v139_v6  ;;  %v89_v29 = vmul.f32 %v142_v19, %v140_v7  ;;  %v75_v31 = vcombine.low %v71_v21, %v72_v24  ;;  %vm127_vm0 = vcmask 7168  }
  0x26   :  { %v101_v30 = vadd.f32 %v99_v23, %v68_v20  ;;  %v106_v32 = vcombine.low %v102_v25, %v103_v26  ;;  %v61_v33 = vcombine.low %v57_v22, %v58_v27 }
  0x27   :  { %v92_v34 = vcombine.low %v88_v28, %v89_v29 }
  0x28   :  { %119 = vadd.xlane.f32.xlu0 %v101_v30  ;;  %v108_v35 = vadd.f32 %v106_v32, %v75_v31 }
  0x29   :  { %v94_v36 = vadd.f32 %v92_v34, %v61_v33 }
  0x2b   :  { %116 = vadd.xlane.f32.xlu1 %v94_v36 }
  0x2c   :  { %122 = vadd.xlane.f32.xlu0 %v108_v35 }
  0xb1   :  { %v120_v37 = vpop.xlane.xlu0 %119 }
  0xb4   :  { %v117_v40 = vpop.xlane.xlu1 %116 }
  0xb5   :  { %v123_v38 = vpop.xlane.xlu0 %122 }
  0xb6   :  { %v124_v39 = vmul.f32 %v123_v38, %v120_v37 }
  0xb8   :  { %147 = vrsqrt.f32 %v124_v39 }
  0xc5   :  { %v148_v41 = vpop.eup %147 }
  0xc6   :  { %v126_v42 = vmul.f32 %v148_v41, %v117_v40 }
  0xc8   :  { %128 = vst.msk [vmem:[%s223_s2] sm:$0xff] %vm127_vm0, %v126_v42 }
  0xc9   :  { %133 = vsyncpa [#allocation6], 1 }
  0xca   :  { %134 = vsyncpa [#allocation8], 1 }

</bundles_post_ra>
